<compile_context>
chip_gen: v7x
topology: tpu7x:2x2x1
jax: 0.10.0
libtpu: 0.0.40
codegen_flags: <defaults>
</compile_context>

<pallas_src>
import functools

import jax
import jax.numpy as jnp
from jax.experimental import pallas as pl
from jax.experimental.pallas import tpu as pltpu


LANE = 128          # hidden/output feature dims padded to multiples of the 128-lane axis
SUBLANE = 8         # f32 sublane packing: batch tiles kept a multiple of 8
MAX_TM = 1024       # upper bound on the batch tile (perf review: 512-1024)
GRIDLESS_MAX = 256  # batches up to this run as one grid-less, fully VMEM-resident call


def _round_up(x, m):
    return (x + m - 1) // m * m


def _pick_tm(batch):
    """Batch tile for the grid path: as large as possible (<= MAX_TM rows), but keep
    >= 2 grid points so dimension_semantics=("parallel",) can shard the batch axis
    across v7x's two TensorCores. Multiple of 8 for f32 sublane packing."""
    tm = _round_up(pl.cdiv(batch, 2), SUBLANE)
    return max(SUBLANE, min(MAX_TM, tm))


def _fused_mlp_kernel(*refs, n_layers):
    """h = x; for each layer: h = relu(h @ W_i + b_i); write h.

    refs = (x_ref, w0_ref, b0_ref, ..., w_{n-1}_ref, b_{n-1}_ref, o_ref)
    BatchNorm(eval) + Linear bias are pre-folded into (W_i, b_i) on the host.
    Intermediate activations never leave VMEM/vregs. Weights may be bf16; the
    accumulation is always f32 (preferred_element_type).
    """
    x_ref = refs[0]
    o_ref = refs[-1]
    h = x_ref[...]
    for i in range(n_layers):
        w = refs[1 + 2 * i][...]
        b = refs[2 + 2 * i][...]
        z = jnp.dot(h.astype(w.dtype), w, preferred_element_type=jnp.float32)
        z = z + b.astype(jnp.float32)
        h = jnp.maximum(z, 0.0)   # module applies the activation on every layer
    o_ref[...] = h.astype(o_ref.dtype)


def fused_mlp(x, folded_params, out_features_pad):
    """x: (B, feat) unpadded input. folded_params: list of (W (in, out_pad), b (1, out_pad))
    where layer 0 keeps the true input width and deeper layers are 128-lane padded."""
    n_layers = len(folded_params)
    batch, feat = x.shape
    kernel = functools.partial(_fused_mlp_kernel, n_layers=n_layers)

    flat_inputs = [x]
    for w, b in folded_params:
        flat_inputs += [w, b]
    out_shape = jax.ShapeDtypeStruct((batch, out_features_pad), x.dtype)

    if batch <= GRIDLESS_MAX:
        # Small batch: single-shot kernel, all operands resident in VMEM, no grid.
        vmem = pl.BlockSpec(memory_space=pltpu.MemorySpace.VMEM)
        return pl.pallas_call(
            kernel,
            out_shape=out_shape,
            in_specs=[vmem] * len(flat_inputs),
            out_specs=vmem,
        )(*flat_inputs)

    # Large batch: tile over batch with a big tile and a ragged last block
    # (no host-side batch padding). Weights/biases use a constant block index so
    # they stay resident; x / out tiles are pipelined by BlockSpec.
    tm = _pick_tm(batch)
    grid = (pl.cdiv(batch, tm),)

    in_specs = [pl.BlockSpec((tm, feat), lambda i: (i, 0))]
    for w, b in folded_params:
        in_specs.append(pl.BlockSpec(w.shape, lambda i: (0, 0)))
        in_specs.append(pl.BlockSpec(b.shape, lambda i: (0, 0)))
    out_spec = pl.BlockSpec((tm, out_features_pad), lambda i: (i, 0))

    # Rough VMEM footprint: double-buffered x/out tiles + (default double-buffered)
    # resident weights. Only raise the scoped-VMEM limit if it's actually needed
    # (keeps small cases untouched; caps well under v7x's 64 MiB physical VMEM).
    vmem_bytes = 2 * tm * feat * x.dtype.itemsize
    vmem_bytes += 2 * tm * out_features_pad * x.dtype.itemsize
    for w, b in folded_params:
        vmem_bytes += 2 * (w.size * w.dtype.itemsize + b.size * b.dtype.itemsize)
    cp_kwargs = dict(dimension_semantics=("parallel",))
    if vmem_bytes > 12 * 1024 * 1024:
        cp_kwargs["vmem_limit_bytes"] = min(2 * vmem_bytes, 48 * 1024 * 1024)

    return pl.pallas_call(
        kernel,
        out_shape=out_shape,
        grid_spec=pl.GridSpec(grid=grid, in_specs=in_specs, out_specs=out_spec),
        compiler_params=pltpu.CompilerParams(**cp_kwargs),
    )(*flat_inputs)


def init_mlp_params(key, input_size, hidden_size, dtype=jnp.float32):
    """Raw parameters mirroring the PyTorch module (Linear + BatchNorm1d, eval mode)."""
    in_sizes = [input_size] + hidden_size[:-1]
    n_layers = len(hidden_size)
    params = []
    for i in range(n_layers):
        key, kw, kb, kg, kbeta, km, kv = jax.random.split(key, 7)
        fan_in, fan_out = in_sizes[i], hidden_size[i]
        bound = 1.0 / jnp.sqrt(fan_in)
        w = jax.random.uniform(kw, (fan_in, fan_out), dtype, -bound, bound)
        b = jax.random.uniform(kb, (fan_out,), dtype, -bound, bound)
        if i < n_layers - 1:   # BatchNorm only on the first n_layers-1 layers
            gamma = 1.0 + 0.1 * jax.random.normal(kg, (fan_out,), dtype)
            beta = 0.1 * jax.random.normal(kbeta, (fan_out,), dtype)
            mean = 0.1 * jax.random.normal(km, (fan_out,), dtype)
            var = jnp.abs(1.0 + 0.1 * jax.random.normal(kv, (fan_out,), dtype))
            bn = (gamma, beta, mean, var)
        else:
            bn = None
        params.append({'w': w, 'b': b, 'bn': bn})
    return params


def fold_and_pad_params(params, eps=1e-5, dtype=jnp.float32):
    """Fold bias + eval-mode BatchNorm into (W', b'):
         s = gamma/sqrt(var+eps);  W' = W*s;  b' = b*s + (beta - mean*s)
    Output feature dims are zero-padded to 128 lanes (exact: padded columns stay 0
    through bias + ReLU, padded weight rows are 0). Layer 0 keeps its TRUE input
    width so the unpadded x can be fed directly (no host-side zero-pad of x)."""
    folded = []
    for i, p in enumerate(params):
        w, b = p['w'], p['b']
        if p['bn'] is not None:
            gamma, beta, mean, var = p['bn']
            s = gamma / jnp.sqrt(var + eps)
            w = w * s[None, :]
            b = b * s + (beta - mean * s)
        fi, fo = w.shape
        fi_p = fi if i == 0 else _round_up(fi, LANE)
        fo_p = _round_up(fo, LANE)
        w_pad = jnp.zeros((fi_p, fo_p), dtype).at[:fi, :fo].set(w.astype(dtype))
        b_pad = jnp.zeros((1, fo_p), dtype).at[0, :fo].set(b.astype(dtype))
        folded.append((w_pad, b_pad))
    return folded


def mlp_forward(x, folded_params, out_features):
    """Run the fused kernel on the unpadded input, slice off the lane padding."""
    out_pad = folded_params[-1][0].shape[1]
    y_pad = fused_mlp(x, folded_params, out_pad)
    return y_pad[:, :out_features]


def mlp_reference(x, params, eps=1e-5):
    """Plain-JAX reference matching the PyTorch module in eval mode (dropout p=0)."""
    out = x
    for p in params:
        out = out @ p['w'] + p['b']
        if p['bn'] is not None:
            gamma, beta, mean, var = p['bn']
            out = (out - mean) / jnp.sqrt(var + eps) * gamma + beta
        out = jnp.maximum(out, 0.0)
    return out


if __name__ == "__main__":
    key = jax.random.PRNGKey(0)
    kx_small, kx_big, kp = jax.random.split(key, 3)

    input_size = 32
    hidden_size = [32, 32, 16]   # n_layers = 3

    params = init_mlp_params(kp, input_size, hidden_size)

    # Exact f32 path (matches the PyTorch module's eval-mode numerics).
    folded_f32 = fold_and_pad_params(params, dtype=jnp.float32)

    # Small batch -> grid-less single-shot fused kernel.
    x_small = jax.random.normal(kx_small, (8, input_size), jnp.float32)
    out_small = jax.block_until_ready(mlp_forward(x_small, folded_f32, hidden_size[-1]))
    ref_small = mlp_reference(x_small, params)
    assert out_small.shape == (8, hidden_size[-1])
    assert jnp.allclose(out_small, ref_small, atol=1e-4, rtol=1e-4), "small-batch mismatch"

    # Larger, non-tile-aligned batch -> 2-point "parallel" batch grid (TM = 504) with a
    # ragged last tile; no host-side padding of either axis of x.
    x_big = jax.random.normal(kx_big, (1000, input_size), jnp.float32)
    out_big = jax.block_until_ready(mlp_forward(x_big, folded_f32, hidden_size[-1]))
    ref_big = mlp_reference(x_big, params)
    assert out_big.shape == (1000, hidden_size[-1])
    assert jnp.allclose(out_big, ref_big, atol=1e-4, rtol=1e-4), "big-batch mismatch"

    # Optional bf16-weight path (native MXU dtype, half the weight DMA bytes,
    # f32 accumulation). Tolerance loosened by design for the reduced-precision weights.
    folded_bf16 = fold_and_pad_params(params, dtype=jnp.bfloat16)
    out_bf16 = jax.block_until_ready(mlp_forward(x_big, folded_bf16, hidden_size[-1]))
    assert out_bf16.shape == (1000, hidden_size[-1])
    assert jnp.allclose(out_bf16, ref_big, atol=1e-1, rtol=1e-1), "bf16 mismatch"

    # TODO(synk): training-mode dropout (p > 0) and batch-statistics BatchNorm are not
    # implemented; module defaults (p = 0) and eval mode make both identity/affine here.
    print("KERNEL_OK")
</pallas_src>

<mosaic_0001>
module attributes {stable_mosaic.version = 11 : i64} {
  func.func @_fused_mlp_kernel(%arg0: memref<8x32xf32, #tpu.memory_space<vmem>>, %arg1: memref<32x128xf32, #tpu.memory_space<vmem>>, %arg2: memref<1x128xf32, #tpu.memory_space<vmem>>, %arg3: memref<128x128xf32, #tpu.memory_space<vmem>>, %arg4: memref<1x128xf32, #tpu.memory_space<vmem>>, %arg5: memref<128x128xf32, #tpu.memory_space<vmem>>, %arg6: memref<1x128xf32, #tpu.memory_space<vmem>>, %arg7: memref<8x128xf32, #tpu.memory_space<vmem>>) attributes {dimension_semantics = [], scalar_prefetch = 0 : i64, scratch_operands = 0 : i64, tpu.core_type = #tpu.core_type<tc>} {
    %c0 = arith.constant 0 : index
    %c0_0 = arith.constant 0 : index
    %0 = vector.load %arg0[%c0, %c0_0] : memref<8x32xf32, #tpu.memory_space<vmem>>, vector<8x32xf32>
    %c0_1 = arith.constant 0 : index
    %c0_2 = arith.constant 0 : index
    %1 = vector.load %arg1[%c0_1, %c0_2] : memref<32x128xf32, #tpu.memory_space<vmem>>, vector<32x128xf32>
    %c0_3 = arith.constant 0 : index
    %c0_4 = arith.constant 0 : index
    %2 = vector.load %arg2[%c0_3, %c0_4] : memref<1x128xf32, #tpu.memory_space<vmem>>, vector<1x128xf32>
    %cst = arith.constant dense<0.000000e+00> : vector<8x128xf32>
    %3 = tpu.matmul %0, %1, %cst {dimension_numbers = #tpu.dot_dimension_numbers<[1], [0], [0], [1], [0, 0, 1, 1], [], []>} : vector<8x32xf32>, vector<32x128xf32>, vector<8x128xf32> -> vector<8x128xf32>
    %4 = vector.broadcast %2 : vector<1x128xf32> to vector<8x128xf32>
    %5 = arith.addf %3, %4 : vector<8x128xf32>
    %cst_5 = arith.constant 0.000000e+00 : f32
    %6 = vector.broadcast %cst_5 : f32 to vector<8x128xf32>
    %7 = arith.maximumf %5, %6 : vector<8x128xf32>
    %c0_6 = arith.constant 0 : index
    %c0_7 = arith.constant 0 : index
    %8 = vector.load %arg3[%c0_6, %c0_7] : memref<128x128xf32, #tpu.memory_space<vmem>>, vector<128x128xf32>
    %c0_8 = arith.constant 0 : index
    %c0_9 = arith.constant 0 : index
    %9 = vector.load %arg4[%c0_8, %c0_9] : memref<1x128xf32, #tpu.memory_space<vmem>>, vector<1x128xf32>
    %cst_10 = arith.constant dense<0.000000e+00> : vector<8x128xf32>
    %10 = tpu.matmul %7, %8, %cst_10 {dimension_numbers = #tpu.dot_dimension_numbers<[1], [0], [0], [1], [0, 0, 1, 1], [], []>} : vector<8x128xf32>, vector<128x128xf32>, vector<8x128xf32> -> vector<8x128xf32>
    %11 = vector.broadcast %9 : vector<1x128xf32> to vector<8x128xf32>
    %12 = arith.addf %10, %11 : vector<8x128xf32>
    %cst_11 = arith.constant 0.000000e+00 : f32
    %13 = vector.broadcast %cst_11 : f32 to vector<8x128xf32>
    %14 = arith.maximumf %12, %13 : vector<8x128xf32>
    %c0_12 = arith.constant 0 : index
    %c0_13 = arith.constant 0 : index
    %15 = vector.load %arg5[%c0_12, %c0_13] : memref<128x128xf32, #tpu.memory_space<vmem>>, vector<128x128xf32>
    %c0_14 = arith.constant 0 : index
    %c0_15 = arith.constant 0 : index
    %16 = vector.load %arg6[%c0_14, %c0_15] : memref<1x128xf32, #tpu.memory_space<vmem>>, vector<1x128xf32>
    %cst_16 = arith.constant dense<0.000000e+00> : vector<8x128xf32>
    %17 = tpu.matmul %14, %15, %cst_16 {dimension_numbers = #tpu.dot_dimension_numbers<[1], [0], [0], [1], [0, 0, 1, 1], [], []>} : vector<8x128xf32>, vector<128x128xf32>, vector<8x128xf32> -> vector<8x128xf32>
    %18 = vector.broadcast %16 : vector<1x128xf32> to vector<8x128xf32>
    %19 = arith.addf %17, %18 : vector<8x128xf32>
    %cst_17 = arith.constant 0.000000e+00 : f32
    %20 = vector.broadcast %cst_17 : f32 to vector<8x128xf32>
    %21 = arith.maximumf %19, %20 : vector<8x128xf32>
    %c0_18 = arith.constant 0 : index
    %c0_19 = arith.constant 0 : index
    %22 = vector.load %arg7[%c0_18, %c0_19] : memref<8x128xf32, #tpu.memory_space<vmem>>, vector<8x128xf32>
    tpu.vector_store %arg7[%c0_18, %c0_19], %21 {strides = array<i32>} : memref<8x128xf32, #tpu.memory_space<vmem>>, vector<8x128xf32>,
    return
  }
}

</mosaic_0001>

<bundles_post_ra>
// kernel: tpu_custom_call.1
= control target key start
LH: loop header
LB: loop body
LE: loop exit
PB: predicated region body
PF: predicated region fallthrough
CT: control target
= control target key end

     0   :  { %12 = vsyncpa [#allocation3], 0  ;;  %s828_s0 = inlined_call_operand.hbm [shape: f32[8,32], index: 0, kind: input, shape index: {}]   ;;  %s829_s1 = inlined_call_operand.hbm [shape: f32[32,128], index: 1, kind: input, shape index: {}]   ;;  %s830_s2 = inlined_call_operand.vmem [shape: f32[1,128], index: 2, kind: input, shape index: {}]   ;;  %s831_s3 = inlined_call_operand.hbm [shape: f32[128,128], index: 3, kind: input, shape index: {}]   ;;  %s832_s4 = inlined_call_operand.vmem [shape: f32[1,128], index: 4, kind: input, shape index: {}]   ;;  %s833_s5 = inlined_call_operand.hbm [shape: f32[128,128], index: 5, kind: input, shape index: {}]   ;;  %s834_s6 = inlined_call_operand.vmem [shape: f32[1,128], index: 6, kind: input, shape index: {}]   ;;  %s835_s7 = inlined_call_operand.hbm [shape: f32[8,128], index: 7, kind: output, shape index: {}]  }
   0x1   :  { %13 = vsyncpa [#allocation6], 0 }
   0x2   :  { %14 = vsyncpa [#allocation9], 0 }
   0x3   :  { %15 = vsyncpa [#allocation4], 0  ;;  %s679_s24 = smov [#allocation5]   ;;  %s561_s28 = scalar_lea.hbm %s829_s1, 512 }
   0x4   :  { %s31_s25 = sshll.u32 %s679_s24, 4  ;;  %p562_p0 = scmp.ne.s32.totalorder %s829_s1, %s561_s28  ;;  %s32_s25 = int_to_ptr.vmem [resolvable:$true] %s31_s25 }
   0x5   :  { %p565_p1 = scmp.lt.u32.totalorder %s561_s28, %s829_s1 }
   0x7   :  { %p567_p2 = pnand %p565_p1, %p562_p0 }
   0x9   :  { %570 = shalt.err (!%p567_p2)
}
   0xa   :  { %s571_s10 = scalar_lea.vmem %s32_s25, 512  ;;  %p576_p4 = scmp.lt.s32.totalorder %s32_s25, %s32_s25 }
   0xb   :  { %p572_p3 = scmp.ne.s32.totalorder %s32_s25, %s571_s10  ;;  %p577_p5 = scmp.lt.s32.totalorder %s571_s10, %s571_s10 }
   0xd   :  { %p578_p6 = por %p577_p5, %p576_p4 }
   0xf   :  { %p579_p7 = pnand %p578_p6, %p572_p3 }
  0x11   :  { %582 = shalt.err (!%p579_p7)
}
  0x12   :  { %s680_s11 = smov 128   ;;  %s681_s12 = smov 8  }
  0x13   :  { %37 = dma.hbm_to_vmem [thread:$0]  %s829_s1, 512, %s32_s25, [#allocation6], %s680_s11, %s680_s11, %s681_s12  }
  0x14   :  { %s682_s15 = smov [#allocation2]   ;;  %s683_s17 = smov [#allocation7]  }
  0x15   :  { %s22_s16 = sshll.u32 %s682_s15, 4  ;;  %s45_s18 = sshll.u32 %s683_s17, 4  ;;  %s23_s16 = int_to_ptr.vmem [resolvable:$true] %s22_s16  ;;  %s46_s18 = int_to_ptr.vmem [resolvable:$true] %s45_s18 }
  0x16   :  { %s583_s21 = scalar_lea.hbm %s828_s0, 128 }
  0x17   :  { %p584_p8 = scmp.ne.s32.totalorder %s828_s0, %s583_s21  ;;  %p587_p9 = scmp.lt.u32.totalorder %s583_s21, %s828_s0 }
  0x19   :  { %p589_p10 = pnand %p587_p9, %p584_p8 }
  0x1b   :  { %592 = shalt.err (!%p589_p10)
}
  0x1c   :  { %s593_s1 = scalar_lea.vmem %s23_s16, 128  ;;  %p598_p12 = scmp.lt.s32.totalorder %s23_s16, %s23_s16 }
  0x1d   :  { %p594_p11 = scmp.ne.s32.totalorder %s23_s16, %s593_s1  ;;  %p599_p13 = scmp.lt.s32.totalorder %s593_s1, %s593_s1 }
  0x1f   :  { %p600_p0 = por %p599_p13, %p598_p12 }
  0x21   :  { %p601_p1 = pnand %p600_p0, %p594_p11 }
  0x23   :  { %604 = shalt.err (!%p601_p1)
}
  0x24   :  { %25 = dma.hbm_to_vmem [thread:$0]  %s828_s0, 128, %s23_s16, [#allocation3]  }
  0x25   :  { %s605_s30 = scalar_lea.hbm %s831_s3, 2048 }
  0x26   :  { %p606_p2 = scmp.ne.s32.totalorder %s831_s3, %s605_s30  ;;  %p609_p3 = scmp.lt.u32.totalorder %s605_s30, %s831_s3 }
  0x28   :  { %p611_p4 = pnand %p609_p3, %p606_p2 }
  0x2a   :  { %614 = shalt.err (!%p611_p4)
}
  0x2b   :  { %s615_s14 = scalar_lea.vmem %s46_s18, 2048  ;;  %p620_p6 = scmp.lt.s32.totalorder %s46_s18, %s46_s18 }
  0x2c   :  { %p616_p5 = scmp.ne.s32.totalorder %s46_s18, %s615_s14  ;;  %p621_p7 = scmp.lt.s32.totalorder %s615_s14, %s615_s14 }
  0x2e   :  { %p622_p8 = por %p621_p7, %p620_p6 }
  0x30   :  { %p623_p9 = pnand %p622_p8, %p616_p5 }
  0x32   :  { %626 = shalt.err (!%p623_p9)
}
  0x33   :  { %51 = dma.hbm_to_vmem [thread:$0]  %s831_s3, 2048, %s46_s18, [#allocation6], %s680_s11, %s680_s11, %s681_s12  }
  0x34   :  { %s684_s16 = smov [#allocation8]   ;;  %s627_s21 = scalar_lea.hbm %s833_s5, 2048 }
  0x35   :  { %s59_s17 = sshll.u32 %s684_s16, 4  ;;  %p628_p10 = scmp.ne.s32.totalorder %s833_s5, %s627_s21  ;;  %s60_s17 = int_to_ptr.vmem [resolvable:$true] %s59_s17 }
  0x36   :  { %p631_p11 = scmp.lt.u32.totalorder %s627_s21, %s833_s5 }
  0x38   :  { %p633_p12 = pnand %p631_p11, %p628_p10 }
  0x3a   :  { %636 = shalt.err (!%p633_p12)
}
  0x3b   :  { %s637_s1 = scalar_lea.vmem %s60_s17, 2048  ;;  %p642_p0 = scmp.lt.s32.totalorder %s60_s17, %s60_s17 }
  0x3c   :  { %p638_p13 = scmp.ne.s32.totalorder %s60_s17, %s637_s1  ;;  %p643_p1 = scmp.lt.s32.totalorder %s637_s1, %s637_s1 }
  0x3e   :  { %p644_p2 = por %p643_p1, %p642_p0 }
  0x40   :  { %p645_p3 = pnand %p644_p2, %p638_p13 }
  0x42   :  { %648 = shalt.err (!%p645_p3)
}
  0x43   :  { %65 = dma.hbm_to_vmem [thread:$0]  %s833_s5, 2048, %s60_s17, [#allocation9], %s680_s11, %s680_s11, %s681_s12  }
  0x44   :  { %671 = dma.done.wait [#allocation3], 128  }
  0x45   :  { %672 = vsyncadd [#allocation3], 4294967168 }
  0x46   :  { %673 = dma.done.wait [#allocation6], 2560  }
  0x47   :  { %674 = vsyncadd [#allocation6], 4294964736 }
  0x48   :  { %675 = dma.done.wait [#allocation9], 2048  }
  0x49   :  { %676 = vsyncadd [#allocation9], 4294965248  ;;  %v685_v0 = vmov 0.0|0.0   ;;  %vm686_vm0 = vmmov 0   ;;  %v687_v1 = vmov 0.0   ;;  %v81_v2 = vld [vmem:[#allocation5] sm:$0xff] }
  0x4a   :  { %497 = vmatprep.subr.bf16.mxu0 %v685_v0  ;;  %424 = vmatprep.mubr.msk.f32.mxu0 %vm686_vm0, %v687_v1  ;;  %v82_v3 = vld [vmem:[#allocation5 + $0x8] sm:$0xff]  ;;  %v83_v4 = vld [vmem:[#allocation5 + $0x10] sm:$0xff]  ;;  %v84_v6 = vld [vmem:[#allocation5 + $0x18] sm:$0xff]  ;;  %vm92_vm1 = vcmask 261120   ;;  %s688_s28 = smov [#allocation10]  }
  0x4b   :  { %503 = vmatprep.subr.bf16.mxu1 %v685_v0  ;;  %459 = vmatprep.mubr.msk.f32.mxu1 %vm686_vm0, %v687_v1  ;;  %v498_v5 = vpack.c.bf16 %v82_v3, %v81_v2  ;;  %v167_v7 = vld [vmem:[#allocation7] sm:$0xff]  ;;  %v168_v8 = vld [vmem:[#allocation7 + $0x8] sm:$0xff]  ;;  %v169_v9 = vld [vmem:[#allocation7 + $0x10] sm:$0xff]  ;;  %v501_v11 = vpack.c.bf16 %v84_v6, %v83_v4  ;;  %s362_s29 = sshll.u32 %s688_s28, 4  ;;  %s363_s29 = int_to_ptr.vmem [resolvable:$true] %s362_s29 }
  0x4c   :  { %v170_v10 = vld [vmem:[#allocation7 + $0x18] sm:$0xff]  ;;  %v504_v12 = vpack.c.bf16 %v168_v8, %v167_v7  ;;  %v171_v14 = vld [vmem:[#allocation7 + $0x20] sm:$0xff]  ;;  %v172_v15 = vld [vmem:[#allocation7 + $0x28] sm:$0xff]  ;;  %s649_s30 = scalar_lea.vmem %s363_s29, 128  ;;  %p654_p5 = scmp.lt.s32.totalorder %s363_s29, %s363_s29 }
  0x4d   :  { %499 = vmatpush3.bf16.msra.mxu0 %v498_v5  ;;  %v507_v13 = vpack.c.bf16 %v170_v10, %v169_v9  ;;  %v80_v16 = vld [vmem:[#allocation2] sm:$0xff]  ;;  %v510_v17 = vpack.c.bf16 %v172_v15, %v171_v14  ;;  %v173_v18 = vld [vmem:[#allocation7 + $0x30] sm:$0xff]  ;;  %v175_v21 = vld [vmem:[#allocation7 + $0x40] sm:$0xff]  ;;  %p650_p4 = scmp.ne.s32.totalorder %s363_s29, %s649_s30  ;;  %p655_p6 = scmp.lt.s32.totalorder %s649_s30, %s649_s30 }
  0x4e   :  { %500 = vmatprep.subr.bf16.mxu0 %v685_v0  ;;  %505 = vmatpush3.bf16.msra.mxu1 %v504_v12  ;;  %v174_v19 = vld [vmem:[#allocation7 + $0x38] sm:$0xff]  ;;  %v176_v22 = vld [vmem:[#allocation7 + $0x48] sm:$0xff]  ;;  %v177_v24 = vld [vmem:[#allocation7 + $0x50] sm:$0xff] }
  0x4f   :  { %506 = vmatprep.subr.bf16.mxu1 %v685_v0  ;;  %v513_v20 = vpack.c.bf16 %v174_v19, %v173_v18  ;;  %v516_v23 = vpack.c.bf16 %v176_v22, %v175_v21  ;;  %v178_v25 = vld [vmem:[#allocation7 + $0x58] sm:$0xff]  ;;  %v179_v27 = vld [vmem:[#allocation7 + $0x60] sm:$0xff]  ;;  %v180_v28 = vld [vmem:[#allocation7 + $0x68] sm:$0xff]  ;;  %p656_p7 = por %p655_p6, %p654_p5 }
  0x50   :  { %v519_v26 = vpack.c.bf16 %v178_v25, %v177_v24  ;;  %v522_v29 = vpack.c.bf16 %v180_v28, %v179_v27  ;;  %v181_v30 = vld [vmem:[#allocation7 + $0x70] sm:$0xff]  ;;  %v182_v31 = vld [vmem:[#allocation7 + $0x78] sm:$0xff]  ;;  %v261_v33 = vld [vmem:[#allocation8] sm:$0xff] }
  0x51   :  { %502 = vmatpush3.bf16.msra.mxu0 %v501_v11  ;;  %v525_v32 = vpack.c.bf16 %v182_v31, %v181_v30  ;;  %v262_v34 = vld [vmem:[#allocation8 + $0x8] sm:$0xff]  ;;  %v263_v35 = vld [vmem:[#allocation8 + $0x10] sm:$0xff]  ;;  %v264_v37 = vld [vmem:[#allocation8 + $0x18] sm:$0xff]  ;;  %p657_p8 = pnand %p656_p7, %p650_p4 }
  0x52   :  { %527 = vmatprep.subr.bf16.mxu0 %v685_v0  ;;  %508 = vmatpush3.bf16.msra.mxu1 %v507_v13  ;;  %v528_v36 = vpack.c.bf16 %v262_v34, %v261_v33  ;;  %v531_v38 = vpack.c.bf16 %v264_v37, %v263_v35  ;;  %v265_v39 = vld [vmem:[#allocation8 + $0x20] sm:$0xff]  ;;  %v266_v40 = vld [vmem:[#allocation8 + $0x28] sm:$0xff]  ;;  %v267_v42 = vld [vmem:[#allocation8 + $0x30] sm:$0xff] }
  0x53   :  { %509 = vmatprep.subr.bf16.mxu1 %v685_v0  ;;  %v534_v41 = vpack.c.bf16 %v266_v40, %v265_v39  ;;  %v268_v43 = vld [vmem:[#allocation8 + $0x38] sm:$0xff]  ;;  %v269_v45 = vld [vmem:[#allocation8 + $0x40] sm:$0xff]  ;;  %v270_v46 = vld [vmem:[#allocation8 + $0x48] sm:$0xff] }
  0x54   :  { %425 = vmatmul.mubr.msk.f32.vlgmr.msra.gmra.mrb[0].mxu0 %vm92_vm1, %v80_v16  ;;  %v537_v44 = vpack.c.bf16 %v268_v43, %v267_v42  ;;  %v540_v47 = vpack.c.bf16 %v270_v46, %v269_v45  ;;  %v271_v48 = vld [vmem:[#allocation8 + $0x50] sm:$0xff]  ;;  %v272_v49 = vld [vmem:[#allocation8 + $0x58] sm:$0xff]  ;;  %v273_v51 = vld [vmem:[#allocation8 + $0x60] sm:$0xff] }
  0x55   :  { %494 = vmatprep.mubr.msk.f32.mxu0 %vm686_vm0, %v687_v1  ;;  %529 = vmatpush3.bf16.msra.mxu0 %v528_v36  ;;  %v543_v50 = vpack.c.bf16 %v272_v49, %v271_v48  ;;  %v274_v52 = vld [vmem:[#allocation8 + $0x68] sm:$0xff]  ;;  %v373_v54 = vld [vmem:[%s830_s2] ss:$0 sm:$0xff]  ;;  %v275_v59 = vld [vmem:[#allocation8 + $0x70] sm:$0xff] }
  0x56   :  { %511 = vmatpush3.bf16.msra.mxu1 %v510_v17  ;;  %530 = vmatprep.subr.bf16.mxu0 %v685_v0  ;;  %v546_v53 = vpack.c.bf16 %v274_v52, %v273_v51  ;;  %v276_v60 = vld [vmem:[#allocation8 + $0x78] sm:$0xff] }
  0x57   :  { %512 = vmatprep.subr.bf16.mxu1 %v685_v0  ;;  %v549_v61 = vpack.c.bf16 %v276_v60, %v275_v59  ;;  %v375_v62 = vld [vmem:[%s832_s4] ss:$0 sm:$0xff] }
  0x58   :  { %v376_v3 = vld [vmem:[%s834_s6] ss:$0 sm:$0xff] }
  0x59   :  { %532 = vmatpush3.bf16.msra.mxu0 %v531_v38 }
  0x5a   :  { %514 = vmatpush3.bf16.msra.mxu1 %v513_v20  ;;  %533 = vmatprep.subr.bf16.mxu0 %v685_v0 }
  0x5b   :  { %515 = vmatprep.subr.bf16.mxu1 %v685_v0 }
  0x5d   :  { %535 = vmatpush3.bf16.msra.mxu0 %v534_v41 }
  0x5e   :  { %517 = vmatpush3.bf16.msra.mxu1 %v516_v23  ;;  %536 = vmatprep.subr.bf16.mxu0 %v685_v0 }
  0x5f   :  { %518 = vmatprep.subr.bf16.mxu1 %v685_v0 }
  0x61   :  { %538 = vmatpush3.bf16.msra.mxu0 %v537_v44 }
  0x62   :  { %520 = vmatpush3.bf16.msra.mxu1 %v519_v26  ;;  %539 = vmatprep.subr.bf16.mxu0 %v685_v0 }
  0x63   :  { %521 = vmatprep.subr.bf16.mxu1 %v685_v0 }
  0x65   :  { %541 = vmatpush3.bf16.msra.mxu0 %v540_v47 }
  0x66   :  { %523 = vmatpush3.bf16.msra.mxu1 %v522_v29  ;;  %542 = vmatprep.subr.bf16.mxu0 %v685_v0 }
  0x67   :  { %524 = vmatprep.subr.bf16.mxu1 %v685_v0 }
  0x69   :  { %544 = vmatpush3.bf16.msra.mxu0 %v543_v50 }
  0x6a   :  { %526 = vmatpush3.bf16.msra.mxu1 %v525_v32  ;;  %545 = vmatprep.subr.bf16.mxu0 %v685_v0 }
  0x6d   :  { %547 = vmatpush3.bf16.msra.mxu0 %v546_v53 }
  0x6e   :  { %548 = vmatprep.subr.bf16.mxu0 %v685_v0 }
  0x71   :  { %550 = vmatpush3.bf16.msra.mxu0 %v549_v61 }
 0x127   :  { %v162_v55 = vpop.f32.mrb[0].mxu0 }
 0x128   :  { %v163_v56 = vadd.f32 %v373_v54, %v162_v55  ;;  %v426_v57 = vpop.f32.mrb[1].mxu0 }
 0x12a   :  { %v166_v58 = vmax.f32 %v163_v56, 0.0 }
 0x12c   :  { %460 = vmatmul.mubr.f32.vlgmr.msra.gmra.mrb[0].mxu1 %v166_v58 }
 0x1ff   :  { %v256_v63 = vpop.f32.mrb[0].mxu1 }
 0x200   :  { %v257_v1 = vadd.f32 %v375_v62, %v256_v63  ;;  %v461_v0 = vpop.f32.mrb[1].mxu1 }
 0x202   :  { %v260_v2 = vmax.f32 %v257_v1, 0.0 }
 0x204   :  { %495 = vmatmul.mubr.f32.vlgmr.msra.gmra.mrb[2].mxu0 %v260_v2 }
 0x2d7   :  { %v350_v4 = vpop.f32.mrb[2].mxu0 }
 0x2d8   :  { %v351_v5 = vadd.f32 %v376_v3, %v350_v4  ;;  %v496_v6 = vpop.f32.mrb[3].mxu0 }
 0x2da   :  { %v354_v7 = vmax.f32 %v351_v5, 0.0 }
 0x2dc   :  { %355 = vst [vmem:[#allocation10] sm:$0xff] %v354_v7 }
 0x2dd   :  { %660 = shalt.err (!%p657_p8)
}
 0x2de   :  { %s661_s9 = scalar_lea.hbm %s835_s7, 128 }
 0x2df   :  { %p662_p9 = scmp.ne.s32.totalorder %s835_s7, %s661_s9  ;;  %p665_p10 = scmp.lt.u32.totalorder %s661_s9, %s835_s7 }
 0x2e1   :  { %p667_p11 = pnand %p665_p10, %p662_p9 }
 0x2e3   :  { %670 = shalt.err (!%p667_p11)
}
 0x2e4   :  { %365 = dma.vmem_to_hbm [thread:$0]  %s363_s29, 128, %s835_s7, [#allocation4]  }
 0x2e5   :  { %677 = dma.done.wait [#allocation4], 128  }
 0x2e6   :  { %678 = vsyncadd [#allocation4], 4294967168 }
 0x2e7   :  { %369 = vsyncpa [#allocation3], 1 }
 0x2e8   :  { %370 = vsyncpa [#allocation6], 1 }
 0x2e9   :  { %371 = vsyncpa [#allocation9], 1 }
 0x2ea   :  { %372 = vsyncpa [#allocation4], 1 }

</bundles_post_ra>
